<compile_context>
chip_gen: v6e
topology: v6e:2x2x1
jax: 0.10.0
libtpu: 0.0.40
codegen_flags: <defaults>
</compile_context>

<pallas_src>
import jax
import jax.numpy as jnp
from jax.experimental import pallas as pl
from jax.experimental.pallas import tpu as pltpu


def _pick_lane_tile(hw, cap=2048):
    """Largest multiple of 128 (<= cap) that divides hw, else the full width."""
    if hw % 128 == 0:
        best = 128
        t = 256
        while t <= min(hw, cap):
            if hw % t == 0:
                best = t
            t += 128
        return best
    # Full-extent block is always legal (block dim equals full array dim).
    return hw


def _make_reduce_kernel(n_elems, std_noise):
    """Fused one-pass global moment reduction -> noise_level (1,1)."""

    def kernel(x_ref, nl_ref, s1_ref, s2_ref):
        i = pl.program_id(0)

        @pl.when(i == 0)
        def _():
            s1_ref[...] = jnp.zeros_like(s1_ref)
            s2_ref[...] = jnp.zeros_like(s2_ref)

        x = x_ref[...].astype(jnp.float32)              # (C, tn)
        # Single pass over the tile: sum and sum-of-squares together.
        s1_ref[...] += jnp.sum(x, keepdims=True)        # (1, 1)
        s2_ref[...] += jnp.sum(x * x, keepdims=True)    # (1, 1)

        @pl.when(i == pl.num_programs(0) - 1)
        def _():
            n = jnp.float32(n_elems)
            s1 = s1_ref[...]
            s2 = s2_ref[...]
            # Unbiased variance (matches torch.Tensor.std default), clamped >= 0.
            var = jnp.maximum((s2 - s1 * s1 / n) / (n - 1.0), 0.0)
            nl_ref[...] = jnp.sqrt(var) * jnp.float32(std_noise)

    return kernel


def _apply_kernel(x_ref, cn_ref, nl_ref, o_ref):
    """out = x + channel_noise[:, None] * noise_level, lane-dense tiles."""
    # Hoisted per-channel offset: one tiny (C,1)*(1,1) multiply per tile.
    scaled = cn_ref[...] * nl_ref[...]                  # (C, 1)
    o_ref[...] = (x_ref[...].astype(jnp.float32) + scaled).astype(o_ref.dtype)


def channel_noise(x, channel_noise_vec, std_noise=0.1):
    """x: (C, H, W), channel_noise_vec: (C,) uniform [0,1) floats."""
    C, H, W = x.shape
    HW = H * W
    x2d = x.reshape(C, HW)                              # lane-dense slab
    cn = channel_noise_vec.astype(jnp.float32).reshape(C, 1)

    tn = _pick_lane_tile(HW)
    nt = HW // tn

    # ---- pass 1: global unbiased std -> noise_level (1,1) ----
    nl = pl.pallas_call(
        _make_reduce_kernel(C * HW, std_noise),
        out_shape=jax.ShapeDtypeStruct((1, 1), jnp.float32),
        grid_spec=pltpu.PrefetchScalarGridSpec(
            num_scalar_prefetch=0,
            grid=(nt,),
            in_specs=[pl.BlockSpec((C, tn), lambda i: (0, i))],
            out_specs=pl.BlockSpec((1, 1), lambda i: (0, 0)),
            scratch_shapes=[
                pltpu.VMEM((1, 1), jnp.float32),        # s1 accumulator
                pltpu.VMEM((1, 1), jnp.float32),        # s2 accumulator
            ],
        ),
        compiler_params=pltpu.CompilerParams(
            dimension_semantics=("arbitrary",)),        # sequential accumulation
    )(x2d)

    # ---- pass 2: tiled broadcast-add (independent tiles -> parallel axis) ----
    out2d = pl.pallas_call(
        _apply_kernel,
        out_shape=jax.ShapeDtypeStruct((C, HW), x.dtype),
        grid_spec=pltpu.PrefetchScalarGridSpec(
            num_scalar_prefetch=0,
            grid=(nt,),
            in_specs=[
                pl.BlockSpec((C, tn), lambda i: (0, i)),   # x tile
                pl.BlockSpec((C, 1), lambda i: (0, 0)),    # per-channel noise (resident)
                pl.BlockSpec((1, 1), lambda i: (0, 0)),    # noise_level (resident)
            ],
            out_specs=pl.BlockSpec((C, tn), lambda i: (0, i)),
        ),
        compiler_params=pltpu.CompilerParams(
            dimension_semantics=("parallel",)),         # 2x on v7x dual TC
    )(x2d, cn, nl)

    return out2d.reshape(C, H, W)


def channel_noise_ref(x, channel_noise_vec, std_noise=0.1):
    """Pure-JAX reference matching the PyTorch forward (two-pass std)."""
    n = x.size
    mean = jnp.mean(x)
    var = jnp.sum((x - mean) ** 2) / (n - 1)            # unbiased, like torch.std()
    noise_level = jnp.sqrt(var) * std_noise
    return x + channel_noise_vec.reshape(-1, 1, 1) * noise_level


if __name__ == "__main__":
    key = jax.random.PRNGKey(0)
    kx, kn = jax.random.split(key)

    C, H, W = 4, 16, 16
    x = jax.random.normal(kx, (C, H, W), dtype=jnp.float32)
    # the torch.rand(C) in forward, generated host-side for determinism
    cn_vec = jax.random.uniform(kn, (C,), dtype=jnp.float32)

    out = channel_noise(x, cn_vec, std_noise=0.1)
    out = jax.block_until_ready(out)

    ref = channel_noise_ref(x, cn_vec, std_noise=0.1)
    assert out.shape == (C, H, W)
    # fused one-pass moments vs two-pass reference -> slightly looser tolerance
    assert jnp.allclose(out, ref, atol=1e-4, rtol=1e-4), "mismatch vs reference"

    print("KERNEL_OK")
</pallas_src>

<mosaic_0001>
module attributes {stable_mosaic.version = 11 : i64} {
  func.func @kernel(%arg0: i32, %arg1: memref<4x256xf32, #tpu.memory_space<vmem>>, %arg2: memref<1x1xf32, #tpu.memory_space<vmem>>, %arg3: memref<1x1xf32, #tpu.memory_space<vmem>>, %arg4: memref<1x1xf32, #tpu.memory_space<vmem>>) attributes {dimension_semantics = [#tpu.dimension_semantics<arbitrary>], iteration_bounds = array<i64: 1>, scalar_prefetch = 0 : i64, scratch_operands = 2 : i64, tpu.core_type = #tpu.core_type<tc>, window_params = [{transform_indices = @transform_0, window_bounds = array<i64: 4, 256>}, {pipeline_mode = #tpu.pipeline_mode<synchronous>, transform_indices = @transform_1, window_bounds = array<i64: 1, 1>}]} {
    %c0_i32 = arith.constant 0 : i32
    %0 = arith.cmpi eq, %arg0, %c0_i32 : i32
    %1 = arith.extui %0 : i1 to i32
    %c0_i32_0 = arith.constant 0 : i32
    %2 = arith.cmpi ne, %1, %c0_i32_0 : i32
    scf.if %2 {
      %cst_13 = arith.constant 0.000000e+00 : f32
      %24 = vector.broadcast %cst_13 : f32 to vector<1x1xf32>
      %c0_14 = arith.constant 0 : index
      %c0_15 = arith.constant 0 : index
      %25 = vector.load %arg3[%c0_14, %c0_15] : memref<1x1xf32, #tpu.memory_space<vmem>>, vector<1x1xf32>
      tpu.vector_store %arg3[%c0_14, %c0_15], %24 {strides = array<i32>} : memref<1x1xf32, #tpu.memory_space<vmem>>, vector<1x1xf32>,
      %cst_16 = arith.constant 0.000000e+00 : f32
      %26 = vector.broadcast %cst_16 : f32 to vector<1x1xf32>
      %c0_17 = arith.constant 0 : index
      %c0_18 = arith.constant 0 : index
      %27 = vector.load %arg4[%c0_17, %c0_18] : memref<1x1xf32, #tpu.memory_space<vmem>>, vector<1x1xf32>
      tpu.vector_store %arg4[%c0_17, %c0_18], %26 {strides = array<i32>} : memref<1x1xf32, #tpu.memory_space<vmem>>, vector<1x1xf32>,
    } else {
    }
    %c0 = arith.constant 0 : index
    %c0_1 = arith.constant 0 : index
    %3 = vector.load %arg1[%c0, %c0_1] : memref<4x256xf32, #tpu.memory_space<vmem>>, vector<4x256xf32>
    %c0_2 = arith.constant 0 : index
    %c0_3 = arith.constant 0 : index
    %4 = vector.load %arg3[%c0_2, %c0_3] : memref<1x1xf32, #tpu.memory_space<vmem>>, vector<1x1xf32>
    %5 = vector.shape_cast %3 : vector<4x256xf32> to vector<1x4x256xf32>
    %cst = arith.constant dense<0.000000e+00> : vector<1xf32>
    %6 = vector.multi_reduction <add>, %5, %cst [1, 2] : vector<1x4x256xf32> to vector<1xf32>
    %7 = vector.shape_cast %6 : vector<1xf32> to vector<1x1x1xf32>
    %8 = vector.extract %7[0, 0, 0] : f32 from vector<1x1x1xf32>
    %9 = vector.broadcast %8 : f32 to vector<1x1xf32>
    %10 = arith.addf %4, %9 : vector<1x1xf32>
    %c0_4 = arith.constant 0 : index
    %c0_5 = arith.constant 0 : index
    %11 = vector.load %arg3[%c0_4, %c0_5] : memref<1x1xf32, #tpu.memory_space<vmem>>, vector<1x1xf32>
    tpu.vector_store %arg3[%c0_4, %c0_5], %10 {strides = array<i32>} : memref<1x1xf32, #tpu.memory_space<vmem>>, vector<1x1xf32>,
    %c0_6 = arith.constant 0 : index
    %c0_7 = arith.constant 0 : index
    %12 = vector.load %arg4[%c0_6, %c0_7] : memref<1x1xf32, #tpu.memory_space<vmem>>, vector<1x1xf32>
    %13 = arith.mulf %3, %3 : vector<4x256xf32>
    %14 = vector.shape_cast %13 : vector<4x256xf32> to vector<1x4x256xf32>
    %cst_8 = arith.constant dense<0.000000e+00> : vector<1xf32>
    %15 = vector.multi_reduction <add>, %14, %cst_8 [1, 2] : vector<1x4x256xf32> to vector<1xf32>
    %16 = vector.shape_cast %15 : vector<1xf32> to vector<1x1x1xf32>
    %17 = vector.extract %16[0, 0, 0] : f32 from vector<1x1x1xf32>
    %18 = vector.broadcast %17 : f32 to vector<1x1xf32>
    %19 = arith.addf %12, %18 : vector<1x1xf32>
    %c0_9 = arith.constant 0 : index
    %c0_10 = arith.constant 0 : index
    %20 = vector.load %arg4[%c0_9, %c0_10] : memref<1x1xf32, #tpu.memory_space<vmem>>, vector<1x1xf32>
    tpu.vector_store %arg4[%c0_9, %c0_10], %19 {strides = array<i32>} : memref<1x1xf32, #tpu.memory_space<vmem>>, vector<1x1xf32>,
    %c0_i32_11 = arith.constant 0 : i32
    %21 = arith.cmpi eq, %arg0, %c0_i32_11 : i32
    %22 = arith.extui %21 : i1 to i32
    %c0_i32_12 = arith.constant 0 : i32
    %23 = arith.cmpi ne, %22, %c0_i32_12 : i32
    scf.if %23 {
      %c0_13 = arith.constant 0 : index
      %c0_14 = arith.constant 0 : index
      %24 = vector.load %arg3[%c0_13, %c0_14] : memref<1x1xf32, #tpu.memory_space<vmem>>, vector<1x1xf32>
      %c0_15 = arith.constant 0 : index
      %c0_16 = arith.constant 0 : index
      %25 = vector.load %arg4[%c0_15, %c0_16] : memref<1x1xf32, #tpu.memory_space<vmem>>, vector<1x1xf32>
      %26 = arith.mulf %24, %24 : vector<1x1xf32>
      %cst_17 = arith.constant 1.024000e+03 : f32
      %27 = vector.broadcast %cst_17 : f32 to vector<1x1xf32>
      %28 = arith.divf %26, %27 : vector<1x1xf32>
      %29 = arith.subf %25, %28 : vector<1x1xf32>
      %cst_18 = arith.constant 1.024000e+03 : f32
      %cst_19 = arith.constant 1.000000e+00 : f32
      %30 = arith.subf %cst_18, %cst_19 : f32
      %31 = vector.broadcast %30 : f32 to vector<1x1xf32>
      %32 = arith.divf %29, %31 : vector<1x1xf32>
      %cst_20 = arith.constant 0.000000e+00 : f32
      %33 = vector.broadcast %cst_20 : f32 to vector<1x1xf32>
      %34 = arith.maximumf %32, %33 : vector<1x1xf32>
      %35 = math.sqrt %34 : vector<1x1xf32>
      %cst_21 = arith.constant 1.000000e-01 : f32
      %36 = vector.broadcast %cst_21 : f32 to vector<1x1xf32>
      %37 = arith.mulf %35, %36 : vector<1x1xf32>
      %c0_22 = arith.constant 0 : index
      %c0_23 = arith.constant 0 : index
      %38 = vector.load %arg2[%c0_22, %c0_23] : memref<1x1xf32, #tpu.memory_space<vmem>>, vector<1x1xf32>
      tpu.vector_store %arg2[%c0_22, %c0_23], %37 {strides = array<i32>} : memref<1x1xf32, #tpu.memory_space<vmem>>, vector<1x1xf32>,
    } else {
    }
    return
  }
  func.func @transform_0(%arg0: i32) -> (i32, i32) {
    %c0_i32 = arith.constant 0 : i32
    %c0_i32_0 = arith.constant 0 : i32
    return %c0_i32, %arg0 : i32, i32
  }
  func.func @transform_1(%arg0: i32) -> (i32, i32) {
    %c0_i32 = arith.constant 0 : i32
    %c0_i32_0 = arith.constant 0 : i32
    %c0_i32_1 = arith.constant 0 : i32
    return %c0_i32, %c0_i32_0 : i32, i32
  }
}

</mosaic_0001>

<bundles_post_ra>
// kernel: tpu_custom_call.1
= control target key start
LH: loop header
LB: loop body
LE: loop exit
PB: predicated region body
PF: predicated region fallthrough
CT: control target
= control target key end

     0   :  { %6 = vsyncpa [#allocation5], 0  ;;  %s184_s0 = inlined_call_operand.hbm [shape: f32[4,256], index: 0, kind: input, shape index: {}]   ;;  %s185_s1 = inlined_call_operand.hbm [shape: f32[1,1], index: 1, kind: output, shape index: {}]  }
   0x1   :  { %7 = vsyncpa [#allocation6], 0  ;;  %s160_s6 = smov [#allocation4]  }
   0x2   :  { %s14_s7 = sshll.u32 %s160_s6, 4  ;;  %s15_s7 = int_to_ptr.vmem [resolvable:$true] %s14_s7 }
   0x3   :  { %s124_s8 = scalar_lea.vmem %s15_s7, 128  ;;  %p129_p1 = scmp.lt.s32.totalorder %s15_s7, %s15_s7 }
   0x4   :  { %p125_p0 = scmp.ne.s32.totalorder %s15_s7, %s124_s8  ;;  %p130_p2 = scmp.lt.s32.totalorder %s124_s8, %s124_s8 }
   0x6   :  { %p131_p3 = por %p130_p2, %p129_p1 }
   0x8   :  { %p132_p4 = pnand %p131_p3, %p125_p0 }
   0xa   :  { %135 = shalt.err (!%p132_p4)
}
   0xb   :  { %17 = dma.hbm_to_vmem [thread:$0]  %s184_s0, 128, %s15_s7, [#allocation5]  }
   0xc   :  { %156 = dma.done.wait [#allocation5], 128  }
   0xd   :  { %157 = vsyncadd [#allocation5], 4294967168  ;;  %vm33_vm0 = vcmask 1043456   ;;  %v28_v0 = vld [vmem:[#allocation4] sm:$0xff]  ;;  %vm25_vm1 = vcmask 0   ;;  %v161_v10 = vmov 0.0  }
   0xe   :  { %v31_v1 = vcombine.high %v28_v0, %v28_v0  ;;  %v34_v2 = vsel %vm33_vm0, %v28_v0, 0.0  ;;  %v51_v3 = vmul.f32 %v28_v0, %v28_v0  ;;  %26 = vst.msk [vmem:[#allocation2] sm:$0x1] %vm25_vm1, %v161_v10  ;;  %27 = vst.msk [vmem:[#allocation3] sm:$0x1] %vm25_vm1, %v161_v10  ;;  %s162_s12 = smov [#allocation7]  }
   0xf   :  { %s97_s13 = sshll.u32 %s162_s12, 4  ;;  %s98_s13 = int_to_ptr.vmem [resolvable:$true] %s97_s13 }
  0x10   :  { %v35_v4 = vsel %vm33_vm0, %v31_v1, 0.0  ;;  %v53_v5 = vcombine.high %v51_v3, %v51_v3  ;;  %v55_v6 = vsel %vm33_vm0, %v51_v3, 0.0  ;;  %s136_s14 = scalar_lea.vmem %s98_s13, 16  ;;  %s140_s15 = scalar_lea.vmem %s98_s13, 32 }
  0x11   :  { %v36_v7 = vadd.f32 %v35_v4, %v34_v2  ;;  %p137_p5 = scmp.ne.s32.totalorder %s98_s13, %s136_s14  ;;  %p141_p6 = scmp.lt.s32.totalorder %s98_s13, %s98_s13 }
  0x12   :  { %v56_v8 = vsel %vm33_vm0, %v53_v5, 0.0  ;;  %p142_p7 = scmp.lt.s32.totalorder %s140_s15, %s136_s14 }
  0x13   :  { %37 = vadd.xlane.f32.xlu0 %v36_v7  ;;  %v57_v9 = vadd.f32 %v56_v8, %v55_v6 }
  0x14   :  { %p143_p8 = por %p142_p7, %p141_p6 }
  0x15   :  { %v29_v25 = vld [vmem:[#allocation2] sm:$0x1]  ;;  %v50_v28 = vld [vmem:[#allocation3] sm:$0x1] }
  0x16   :  { %p144_p9 = pnand %p143_p8, %p137_p5 }
  0x17   :  { %58 = vadd.xlane.f32.xlu0 %v57_v9 }
  0x9c   :  { %v38_v11 = vpop.xlane.xlu0 %37 }
  0x9d   :  { %v39_v12 = vrot.slane %v38_v11, 4 }
  0x9f   :  { %v40_v13 = vadd.f32 %v39_v12, %v38_v11 }
  0xa0   :  { %v59_v14 = vpop.xlane.xlu0 %58 }
  0xa1   :  { %v41_v15 = vrot.slane %v40_v13, 2  ;;  %v60_v16 = vrot.slane %v59_v14, 4 }
  0xa3   :  { %v61_v17 = vadd.f32 %v60_v16, %v59_v14  ;;  %v42_v18 = vadd.f32 %v41_v15, %v40_v13 }
  0xa5   :  { %v62_v19 = vrot.slane %v61_v17, 2  ;;  %v43_v20 = vrot.slane %v42_v18, 1 }
  0xa7   :  { %v63_v21 = vadd.f32 %v62_v19, %v61_v17  ;;  %v44_v22 = vadd.f32 %v43_v20, %v42_v18 }
  0xa9   :  { %106 = vpush %v44_v22  ;;  %v64_v23 = vrot.slane %v63_v21, 1 }
  0xab   :  { %v65_v24 = vadd.f32 %v64_v23, %v63_v21 }
  0xad   :  { %108 = vpush %v65_v24 }
  0xda   :  { %s107_s0 = spop %106 }
  0xdb   :  { %v46_v26 = vstv %s107_s0 }
  0xdc   :  { %v47_v27 = vadd.f32 %v46_v26, %v29_v25 }
  0xde   :  { %49 = vst.msk [vmem:[#allocation2] sm:$0x1] %vm25_vm1, %v47_v27  ;;  %s109_s11 = spop %108 }
  0xdf   :  { %v67_v29 = vstv %s109_s11 }
  0xe0   :  { %v68_v30 = vadd.f32 %v67_v29, %v50_v28 }
  0xe2   :  { %69 = vst.msk [vmem:[#allocation3] sm:$0x1] %vm25_vm1, %v68_v30 }
  0xe5   :  { %v73_v31 = vld [vmem:[#allocation2] sm:$0x1] }
  0xe6   :  { %v75_v32 = vmul.f32 %v73_v31, %v73_v31 }
  0xe8   :  { %v77_v33 = vmul.f32 0.0009765625, %v75_v32 }
  0xe9   :  { %v74_v34 = vld [vmem:[#allocation3] sm:$0x1] }
  0xea   :  { %v78_v35 = vsub.f32 %v74_v34, %v77_v33 }
  0xec   :  { %v80_v36 = vmul.f32 0.0009775171, %v78_v35 }
  0xee   :  { %v81_v37 = vmax.f32 %v80_v36, 0.0 }
  0xf0   :  { %114 = vrsqrt.f32 %v81_v37  ;;  %vm84_vm2 = vcmp.eq.f32.partialorder %v81_v37, inf  ;;  %v87_v40 = vand.u32 2147483648, %v81_v37  ;;  %vm86_vm3 = vcmp.eq.f32.partialorder %v81_v37, 0.0 }
  0xfd   :  { %v115_v38 = vpop.eup %114 }
  0xfe   :  { %v83_v39 = vmul.f32 %v115_v38, %v81_v37 }
 0x100   :  { %v85_v41 = vsel %vm84_vm2, %v81_v37, %v83_v39 }
 0x101   :  { %v88_v42 = vsel %vm86_vm3, %v87_v40, %v85_v41 }
 0x102   :  { %v89_v43 = vmul.f32 0.1, %v88_v42 }
 0x104   :  { %90 = vst.msk [vmem:[#allocation7] sm:$0x1] %vm25_vm1, %v89_v43 }
 0x105   :  { %147 = shalt.err (!%p144_p9)
}
 0x106   :  { %100 = dma.vmem_to_hbm [thread:$0]  %s98_s13, 16, %s185_s1, [#allocation6]  }
 0x107   :  { %158 = dma.done.wait [#allocation6], 16  }
 0x108   :  { %159 = vsyncadd [#allocation6], 4294967280 }
 0x109   :  { %104 = vsyncpa [#allocation5], 1 }
 0x10a   :  { %105 = vsyncpa [#allocation6], 1 }

</bundles_post_ra>
